<compile_context>
chip_gen: v7x
topology: tpu7x:2x2x1
jax: 0.10.0
libtpu: 0.0.40
codegen_flags: <defaults>
</compile_context>

<pallas_src>
import jax
import jax.numpy as jnp
from jax.experimental import pallas as pl
from jax.experimental.pallas import tpu as pltpu

LANE = 128          # TPU lane width
MAX_TB = 1024       # max batch-tile (lanes) per grid step; tiny VMEM footprint


def _round_up(n, m):
    return ((n + m - 1) // m) * m


def _mlp_kernel(x_ref, w1_ref, b1_ref, w2_ref, b2_ref, w3_ref, b3_ref, o_ref):
    """One batch tile of the 3-layer MLP, batch mapped to lanes.

    x_ref:  (2,  TB)  f32   input tile, features on sublanes, batch on lanes
    w1_ref: (10, 2)   f32   PyTorch layout (out, in)
    b1_ref: (10, 1)   f32
    w2_ref: (10, 10)  f32
    b2_ref: (10, 1)   f32
    w3_ref: (1,  10)  f32
    b3_ref: (1,  1)   f32
    o_ref:  (1,  TB)  f32   logits tile
    """
    x = x_ref[...]          # (2, TB)
    w1 = w1_ref[...]        # (10, 2)
    w2 = w2_ref[...]        # (10, 10)
    w3 = w3_ref[...]        # (1, 10)

    # ---- Layer 1: (10, TB) = W1 @ x + b1, as 2 VPU broadcast-FMAs ----------
    h = b1_ref[...]                                   # (10, 1) -> broadcasts
    h = h + w1[:, 0:1] * x[0:1, :]                    # (10,1)*(1,TB)->(10,TB)
    h = h + w1[:, 1:2] * x[1:2, :]
    h = jnp.maximum(h, 0.0)                           # ReLU

    # ---- Layer 2: (10, TB) = W2 @ h + b2, 10 broadcast-FMAs (unrolled) -----
    h2 = b2_ref[...]                                  # (10, 1)
    for k in range(w2.shape[1]):                      # static, 10 iters
        h2 = h2 + w2[:, k:k + 1] * h[k:k + 1, :]
    h2 = jnp.maximum(h2, 0.0)                         # ReLU

    # ---- Layer 3: (1, TB) = W3 @ h2 + b3, 10-term weighted sum -------------
    out = b3_ref[...]                                 # (1, 1)
    for k in range(w3.shape[1]):                      # static, 10 iters
        out = out + w3[:, k:k + 1] * h2[k:k + 1, :]

    o_ref[...] = out                                  # logits (no sigmoid)


def nonlinear_model_v0_forward(x, w1, b1, w2, b2, w3, b3):
    """Forward pass matching NonLinearModelV0.forward (returns logits).

    x : (B, 2) float32
    w1: (10, 2), b1: (10,)   -- PyTorch Linear layout (out, in)
    w2: (10, 10), b2: (10,)
    w3: (1, 10),  b3: (1,)
    returns: (B, 1) float32 logits
    """
    B, in_f = x.shape
    hid = w1.shape[0]
    out_f = w3.shape[0]
    f32 = jnp.float32

    # Batch tile: one 128-lane block for small batches, up to MAX_TB for big ones.
    TB = min(MAX_TB, _round_up(B, LANE))
    B_P = _round_up(B, TB)
    grid = (B_P // TB,)

    # Batch-on-lanes layout: (features, batch), zero-padded along batch only.
    # Bytes moved: 8 * B_P in, 4 * B_P out (vs 512+512 per row previously).
    xT = x.T.astype(f32)
    if B_P != B:
        xT = jnp.pad(xT, ((0, 0), (0, B_P - B)))

    # Biases as (rows, 1) columns so they broadcast along lanes in-kernel.
    b1c = b1.astype(f32).reshape(hid, 1)
    b2c = b2.astype(f32).reshape(hid, 1)
    b3c = b3.astype(f32).reshape(out_f, 1)

    out = pl.pallas_call(
        _mlp_kernel,
        out_shape=jax.ShapeDtypeStruct((out_f, B_P), f32),
        grid_spec=pltpu.PrefetchScalarGridSpec(
            num_scalar_prefetch=0,
            grid=grid,
            in_specs=[
                pl.BlockSpec((in_f, TB), lambda i: (0, i)),     # x tile
                pl.BlockSpec((hid, in_f), lambda i: (0, 0)),    # W1 (resident)
                pl.BlockSpec((hid, 1), lambda i: (0, 0)),       # b1
                pl.BlockSpec((hid, hid), lambda i: (0, 0)),     # W2
                pl.BlockSpec((hid, 1), lambda i: (0, 0)),       # b2
                pl.BlockSpec((out_f, hid), lambda i: (0, 0)),   # W3
                pl.BlockSpec((out_f, 1), lambda i: (0, 0)),     # b3
            ],
            out_specs=pl.BlockSpec((out_f, TB), lambda i: (0, i)),
        ),
        compiler_params=pltpu.CompilerParams(
            dimension_semantics=("parallel",)),   # shard batch across TCs (v7x)
    )(xT, w1.astype(f32), b1c, w2.astype(f32), b2c, w3.astype(f32), b3c)

    # (1, B_P) -> (B, 1); only the real batch columns are returned.
    return out[:, :B].T


def _init_linear_params(key, out_features, in_features):
    """Deterministic init mirroring PyTorch nn.Linear default:
    U(-1/sqrt(fan_in), 1/sqrt(fan_in)) for both weight and bias."""
    kw, kb = jax.random.split(key)
    bound = 1.0 / (in_features ** 0.5)
    w = jax.random.uniform(kw, (out_features, in_features),
                           jnp.float32, -bound, bound)
    b = jax.random.uniform(kb, (out_features,), jnp.float32, -bound, bound)
    return w, b


if __name__ == "__main__":
    root = jax.random.PRNGKey(0)
    k_x, k1, k2, k3 = jax.random.split(root, 4)

    # Shapes implied by the module: in_features=2 -> 10 -> 10 -> 1
    B = 8
    x = jax.random.normal(k_x, (B, 2), jnp.float32)

    w1, b1 = _init_linear_params(k1, 10, 2)
    w2, b2 = _init_linear_params(k2, 10, 10)
    w3, b3 = _init_linear_params(k3, 1, 10)

    y = nonlinear_model_v0_forward(x, w1, b1, w2, b2, w3, b3)
    y = jax.block_until_ready(y)

    # Pure-JAX reference check of the hot path (forward returns logits;
    # the module's Sigmoid lives in activation_fn, not forward).
    h1 = jnp.maximum(x @ w1.T + b1, 0.0)
    h2 = jnp.maximum(h1 @ w2.T + b2, 0.0)
    y_ref = h2 @ w3.T + b3
    assert y.shape == (B, 1), y.shape
    assert jnp.allclose(y, y_ref, atol=1e-5, rtol=1e-5), (y, y_ref)

    print("KERNEL_OK")
</pallas_src>

<mosaic_0001>
module attributes {stable_mosaic.version = 11 : i64} {
  func.func @_mlp_kernel(%arg0: i32, %arg1: memref<2x128xf32, #tpu.memory_space<vmem>>, %arg2: memref<10x2xf32, #tpu.memory_space<vmem>>, %arg3: memref<10x1xf32, #tpu.memory_space<vmem>>, %arg4: memref<10x10xf32, #tpu.memory_space<vmem>>, %arg5: memref<10x1xf32, #tpu.memory_space<vmem>>, %arg6: memref<1x10xf32, #tpu.memory_space<vmem>>, %arg7: memref<1x1xf32, #tpu.memory_space<vmem>>, %arg8: memref<1x128xf32, #tpu.memory_space<vmem>>) attributes {dimension_semantics = [#tpu.dimension_semantics<parallel>], iteration_bounds = array<i64: 1>, scalar_prefetch = 0 : i64, scratch_operands = 0 : i64, tpu.core_type = #tpu.core_type<tc>, window_params = [{transform_indices = @transform_0, window_bounds = array<i64: 2, 128>}, {pipeline_mode = #tpu.pipeline_mode<synchronous>, transform_indices = @transform_1, window_bounds = array<i64: 10, 2>}, {pipeline_mode = #tpu.pipeline_mode<synchronous>, transform_indices = @transform_2, window_bounds = array<i64: 10, 1>}, {pipeline_mode = #tpu.pipeline_mode<synchronous>, transform_indices = @transform_3, window_bounds = array<i64: 10, 10>}, {pipeline_mode = #tpu.pipeline_mode<synchronous>, transform_indices = @transform_4, window_bounds = array<i64: 10, 1>}, {pipeline_mode = #tpu.pipeline_mode<synchronous>, transform_indices = @transform_5, window_bounds = array<i64: 1, 10>}, {pipeline_mode = #tpu.pipeline_mode<synchronous>, transform_indices = @transform_6, window_bounds = array<i64: 1, 1>}, {transform_indices = @transform_7, window_bounds = array<i64: 1, 128>}]} {
    %c0 = arith.constant 0 : index
    %c0_0 = arith.constant 0 : index
    %0 = vector.load %arg1[%c0, %c0_0] : memref<2x128xf32, #tpu.memory_space<vmem>>, vector<2x128xf32>
    %c0_1 = arith.constant 0 : index
    %c0_2 = arith.constant 0 : index
    %1 = vector.load %arg2[%c0_1, %c0_2] : memref<10x2xf32, #tpu.memory_space<vmem>>, vector<10x2xf32>
    %c0_3 = arith.constant 0 : index
    %c0_4 = arith.constant 0 : index
    %2 = vector.load %arg4[%c0_3, %c0_4] : memref<10x10xf32, #tpu.memory_space<vmem>>, vector<10x10xf32>
    %c0_5 = arith.constant 0 : index
    %c0_6 = arith.constant 0 : index
    %3 = vector.load %arg6[%c0_5, %c0_6] : memref<1x10xf32, #tpu.memory_space<vmem>>, vector<1x10xf32>
    %c0_7 = arith.constant 0 : index
    %c0_8 = arith.constant 0 : index
    %4 = vector.load %arg3[%c0_7, %c0_8] : memref<10x1xf32, #tpu.memory_space<vmem>>, vector<10x1xf32>
    %5 = vector.extract_strided_slice %1 {offsets = [0, 0], sizes = [10, 1], strides = [1, 1]} : vector<10x2xf32> to vector<10x1xf32>
    %6 = vector.extract_strided_slice %0 {offsets = [0, 0], sizes = [1, 128], strides = [1, 1]} : vector<2x128xf32> to vector<1x128xf32>
    %7 = vector.broadcast %5 : vector<10x1xf32> to vector<10x128xf32>
    %8 = vector.broadcast %6 : vector<1x128xf32> to vector<10x128xf32>
    %9 = arith.mulf %7, %8 : vector<10x128xf32>
    %10 = vector.broadcast %4 : vector<10x1xf32> to vector<10x128xf32>
    %11 = arith.addf %10, %9 : vector<10x128xf32>
    %12 = vector.extract_strided_slice %1 {offsets = [0, 1], sizes = [10, 1], strides = [1, 1]} : vector<10x2xf32> to vector<10x1xf32>
    %13 = vector.extract_strided_slice %0 {offsets = [1, 0], sizes = [1, 128], strides = [1, 1]} : vector<2x128xf32> to vector<1x128xf32>
    %14 = vector.broadcast %12 : vector<10x1xf32> to vector<10x128xf32>
    %15 = vector.broadcast %13 : vector<1x128xf32> to vector<10x128xf32>
    %16 = arith.mulf %14, %15 : vector<10x128xf32>
    %17 = arith.addf %11, %16 : vector<10x128xf32>
    %cst = arith.constant 0.000000e+00 : f32
    %18 = vector.broadcast %cst : f32 to vector<10x128xf32>
    %19 = arith.maximumf %17, %18 : vector<10x128xf32>
    %c0_9 = arith.constant 0 : index
    %c0_10 = arith.constant 0 : index
    %20 = vector.load %arg5[%c0_9, %c0_10] : memref<10x1xf32, #tpu.memory_space<vmem>>, vector<10x1xf32>
    %21 = vector.extract_strided_slice %2 {offsets = [0, 0], sizes = [10, 1], strides = [1, 1]} : vector<10x10xf32> to vector<10x1xf32>
    %22 = vector.extract_strided_slice %19 {offsets = [0, 0], sizes = [1, 128], strides = [1, 1]} : vector<10x128xf32> to vector<1x128xf32>
    %23 = vector.broadcast %21 : vector<10x1xf32> to vector<10x128xf32>
    %24 = vector.broadcast %22 : vector<1x128xf32> to vector<10x128xf32>
    %25 = arith.mulf %23, %24 : vector<10x128xf32>
    %26 = vector.broadcast %20 : vector<10x1xf32> to vector<10x128xf32>
    %27 = arith.addf %26, %25 : vector<10x128xf32>
    %28 = vector.extract_strided_slice %2 {offsets = [0, 1], sizes = [10, 1], strides = [1, 1]} : vector<10x10xf32> to vector<10x1xf32>
    %29 = vector.extract_strided_slice %19 {offsets = [1, 0], sizes = [1, 128], strides = [1, 1]} : vector<10x128xf32> to vector<1x128xf32>
    %30 = vector.broadcast %28 : vector<10x1xf32> to vector<10x128xf32>
    %31 = vector.broadcast %29 : vector<1x128xf32> to vector<10x128xf32>
    %32 = arith.mulf %30, %31 : vector<10x128xf32>
    %33 = arith.addf %27, %32 : vector<10x128xf32>
    %34 = vector.extract_strided_slice %2 {offsets = [0, 2], sizes = [10, 1], strides = [1, 1]} : vector<10x10xf32> to vector<10x1xf32>
    %35 = vector.extract_strided_slice %19 {offsets = [2, 0], sizes = [1, 128], strides = [1, 1]} : vector<10x128xf32> to vector<1x128xf32>
    %36 = vector.broadcast %34 : vector<10x1xf32> to vector<10x128xf32>
    %37 = vector.broadcast %35 : vector<1x128xf32> to vector<10x128xf32>
    %38 = arith.mulf %36, %37 : vector<10x128xf32>
    %39 = arith.addf %33, %38 : vector<10x128xf32>
    %40 = vector.extract_strided_slice %2 {offsets = [0, 3], sizes = [10, 1], strides = [1, 1]} : vector<10x10xf32> to vector<10x1xf32>
    %41 = vector.extract_strided_slice %19 {offsets = [3, 0], sizes = [1, 128], strides = [1, 1]} : vector<10x128xf32> to vector<1x128xf32>
    %42 = vector.broadcast %40 : vector<10x1xf32> to vector<10x128xf32>
    %43 = vector.broadcast %41 : vector<1x128xf32> to vector<10x128xf32>
    %44 = arith.mulf %42, %43 : vector<10x128xf32>
    %45 = arith.addf %39, %44 : vector<10x128xf32>
    %46 = vector.extract_strided_slice %2 {offsets = [0, 4], sizes = [10, 1], strides = [1, 1]} : vector<10x10xf32> to vector<10x1xf32>
    %47 = vector.extract_strided_slice %19 {offsets = [4, 0], sizes = [1, 128], strides = [1, 1]} : vector<10x128xf32> to vector<1x128xf32>
    %48 = vector.broadcast %46 : vector<10x1xf32> to vector<10x128xf32>
    %49 = vector.broadcast %47 : vector<1x128xf32> to vector<10x128xf32>
    %50 = arith.mulf %48, %49 : vector<10x128xf32>
    %51 = arith.addf %45, %50 : vector<10x128xf32>
    %52 = vector.extract_strided_slice %2 {offsets = [0, 5], sizes = [10, 1], strides = [1, 1]} : vector<10x10xf32> to vector<10x1xf32>
    %53 = vector.extract_strided_slice %19 {offsets = [5, 0], sizes = [1, 128], strides = [1, 1]} : vector<10x128xf32> to vector<1x128xf32>
    %54 = vector.broadcast %52 : vector<10x1xf32> to vector<10x128xf32>
    %55 = vector.broadcast %53 : vector<1x128xf32> to vector<10x128xf32>
    %56 = arith.mulf %54, %55 : vector<10x128xf32>
    %57 = arith.addf %51, %56 : vector<10x128xf32>
    %58 = vector.extract_strided_slice %2 {offsets = [0, 6], sizes = [10, 1], strides = [1, 1]} : vector<10x10xf32> to vector<10x1xf32>
    %59 = vector.extract_strided_slice %19 {offsets = [6, 0], sizes = [1, 128], strides = [1, 1]} : vector<10x128xf32> to vector<1x128xf32>
    %60 = vector.broadcast %58 : vector<10x1xf32> to vector<10x128xf32>
    %61 = vector.broadcast %59 : vector<1x128xf32> to vector<10x128xf32>
    %62 = arith.mulf %60, %61 : vector<10x128xf32>
    %63 = arith.addf %57, %62 : vector<10x128xf32>
    %64 = vector.extract_strided_slice %2 {offsets = [0, 7], sizes = [10, 1], strides = [1, 1]} : vector<10x10xf32> to vector<10x1xf32>
    %65 = vector.extract_strided_slice %19 {offsets = [7, 0], sizes = [1, 128], strides = [1, 1]} : vector<10x128xf32> to vector<1x128xf32>
    %66 = vector.broadcast %64 : vector<10x1xf32> to vector<10x128xf32>
    %67 = vector.broadcast %65 : vector<1x128xf32> to vector<10x128xf32>
    %68 = arith.mulf %66, %67 : vector<10x128xf32>
    %69 = arith.addf %63, %68 : vector<10x128xf32>
    %70 = vector.extract_strided_slice %2 {offsets = [0, 8], sizes = [10, 1], strides = [1, 1]} : vector<10x10xf32> to vector<10x1xf32>
    %71 = vector.extract_strided_slice %19 {offsets = [8, 0], sizes = [1, 128], strides = [1, 1]} : vector<10x128xf32> to vector<1x128xf32>
    %72 = vector.broadcast %70 : vector<10x1xf32> to vector<10x128xf32>
    %73 = vector.broadcast %71 : vector<1x128xf32> to vector<10x128xf32>
    %74 = arith.mulf %72, %73 : vector<10x128xf32>
    %75 = arith.addf %69, %74 : vector<10x128xf32>
    %76 = vector.extract_strided_slice %2 {offsets = [0, 9], sizes = [10, 1], strides = [1, 1]} : vector<10x10xf32> to vector<10x1xf32>
    %77 = vector.extract_strided_slice %19 {offsets = [9, 0], sizes = [1, 128], strides = [1, 1]} : vector<10x128xf32> to vector<1x128xf32>
    %78 = vector.broadcast %76 : vector<10x1xf32> to vector<10x128xf32>
    %79 = vector.broadcast %77 : vector<1x128xf32> to vector<10x128xf32>
    %80 = arith.mulf %78, %79 : vector<10x128xf32>
    %81 = arith.addf %75, %80 : vector<10x128xf32>
    %cst_11 = arith.constant 0.000000e+00 : f32
    %82 = vector.broadcast %cst_11 : f32 to vector<10x128xf32>
    %83 = arith.maximumf %81, %82 : vector<10x128xf32>
    %c0_12 = arith.constant 0 : index
    %c0_13 = arith.constant 0 : index
    %84 = vector.load %arg7[%c0_12, %c0_13] : memref<1x1xf32, #tpu.memory_space<vmem>>, vector<1x1xf32>
    %85 = vector.extract_strided_slice %3 {offsets = [0, 0], sizes = [1, 1], strides = [1, 1]} : vector<1x10xf32> to vector<1x1xf32>
    %86 = vector.extract_strided_slice %83 {offsets = [0, 0], sizes = [1, 128], strides = [1, 1]} : vector<10x128xf32> to vector<1x128xf32>
    %87 = vector.broadcast %85 : vector<1x1xf32> to vector<1x128xf32>
    %88 = arith.mulf %87, %86 : vector<1x128xf32>
    %89 = vector.broadcast %84 : vector<1x1xf32> to vector<1x128xf32>
    %90 = arith.addf %89, %88 : vector<1x128xf32>
    %91 = vector.extract_strided_slice %3 {offsets = [0, 1], sizes = [1, 1], strides = [1, 1]} : vector<1x10xf32> to vector<1x1xf32>
    %92 = vector.extract_strided_slice %83 {offsets = [1, 0], sizes = [1, 128], strides = [1, 1]} : vector<10x128xf32> to vector<1x128xf32>
    %93 = vector.broadcast %91 : vector<1x1xf32> to vector<1x128xf32>
    %94 = arith.mulf %93, %92 : vector<1x128xf32>
    %95 = arith.addf %90, %94 : vector<1x128xf32>
    %96 = vector.extract_strided_slice %3 {offsets = [0, 2], sizes = [1, 1], strides = [1, 1]} : vector<1x10xf32> to vector<1x1xf32>
    %97 = vector.extract_strided_slice %83 {offsets = [2, 0], sizes = [1, 128], strides = [1, 1]} : vector<10x128xf32> to vector<1x128xf32>
    %98 = vector.broadcast %96 : vector<1x1xf32> to vector<1x128xf32>
    %99 = arith.mulf %98, %97 : vector<1x128xf32>
    %100 = arith.addf %95, %99 : vector<1x128xf32>
    %101 = vector.extract_strided_slice %3 {offsets = [0, 3], sizes = [1, 1], strides = [1, 1]} : vector<1x10xf32> to vector<1x1xf32>
    %102 = vector.extract_strided_slice %83 {offsets = [3, 0], sizes = [1, 128], strides = [1, 1]} : vector<10x128xf32> to vector<1x128xf32>
    %103 = vector.broadcast %101 : vector<1x1xf32> to vector<1x128xf32>
    %104 = arith.mulf %103, %102 : vector<1x128xf32>
    %105 = arith.addf %100, %104 : vector<1x128xf32>
    %106 = vector.extract_strided_slice %3 {offsets = [0, 4], sizes = [1, 1], strides = [1, 1]} : vector<1x10xf32> to vector<1x1xf32>
    %107 = vector.extract_strided_slice %83 {offsets = [4, 0], sizes = [1, 128], strides = [1, 1]} : vector<10x128xf32> to vector<1x128xf32>
    %108 = vector.broadcast %106 : vector<1x1xf32> to vector<1x128xf32>
    %109 = arith.mulf %108, %107 : vector<1x128xf32>
    %110 = arith.addf %105, %109 : vector<1x128xf32>
    %111 = vector.extract_strided_slice %3 {offsets = [0, 5], sizes = [1, 1], strides = [1, 1]} : vector<1x10xf32> to vector<1x1xf32>
    %112 = vector.extract_strided_slice %83 {offsets = [5, 0], sizes = [1, 128], strides = [1, 1]} : vector<10x128xf32> to vector<1x128xf32>
    %113 = vector.broadcast %111 : vector<1x1xf32> to vector<1x128xf32>
    %114 = arith.mulf %113, %112 : vector<1x128xf32>
    %115 = arith.addf %110, %114 : vector<1x128xf32>
    %116 = vector.extract_strided_slice %3 {offsets = [0, 6], sizes = [1, 1], strides = [1, 1]} : vector<1x10xf32> to vector<1x1xf32>
    %117 = vector.extract_strided_slice %83 {offsets = [6, 0], sizes = [1, 128], strides = [1, 1]} : vector<10x128xf32> to vector<1x128xf32>
    %118 = vector.broadcast %116 : vector<1x1xf32> to vector<1x128xf32>
    %119 = arith.mulf %118, %117 : vector<1x128xf32>
    %120 = arith.addf %115, %119 : vector<1x128xf32>
    %121 = vector.extract_strided_slice %3 {offsets = [0, 7], sizes = [1, 1], strides = [1, 1]} : vector<1x10xf32> to vector<1x1xf32>
    %122 = vector.extract_strided_slice %83 {offsets = [7, 0], sizes = [1, 128], strides = [1, 1]} : vector<10x128xf32> to vector<1x128xf32>
    %123 = vector.broadcast %121 : vector<1x1xf32> to vector<1x128xf32>
    %124 = arith.mulf %123, %122 : vector<1x128xf32>
    %125 = arith.addf %120, %124 : vector<1x128xf32>
    %126 = vector.extract_strided_slice %3 {offsets = [0, 8], sizes = [1, 1], strides = [1, 1]} : vector<1x10xf32> to vector<1x1xf32>
    %127 = vector.extract_strided_slice %83 {offsets = [8, 0], sizes = [1, 128], strides = [1, 1]} : vector<10x128xf32> to vector<1x128xf32>
    %128 = vector.broadcast %126 : vector<1x1xf32> to vector<1x128xf32>
    %129 = arith.mulf %128, %127 : vector<1x128xf32>
    %130 = arith.addf %125, %129 : vector<1x128xf32>
    %131 = vector.extract_strided_slice %3 {offsets = [0, 9], sizes = [1, 1], strides = [1, 1]} : vector<1x10xf32> to vector<1x1xf32>
    %132 = vector.extract_strided_slice %83 {offsets = [9, 0], sizes = [1, 128], strides = [1, 1]} : vector<10x128xf32> to vector<1x128xf32>
    %133 = vector.broadcast %131 : vector<1x1xf32> to vector<1x128xf32>
    %134 = arith.mulf %133, %132 : vector<1x128xf32>
    %135 = arith.addf %130, %134 : vector<1x128xf32>
    %c0_14 = arith.constant 0 : index
    %c0_15 = arith.constant 0 : index
    %136 = vector.load %arg8[%c0_14, %c0_15] : memref<1x128xf32, #tpu.memory_space<vmem>>, vector<1x128xf32>
    tpu.vector_store %arg8[%c0_14, %c0_15], %135 {strides = array<i32>} : memref<1x128xf32, #tpu.memory_space<vmem>>, vector<1x128xf32>,
    return
  }
  func.func @transform_0(%arg0: i32) -> (i32, i32) {
    %c0_i32 = arith.constant 0 : i32
    %c0_i32_0 = arith.constant 0 : i32
    return %c0_i32, %arg0 : i32, i32
  }
  func.func @transform_1(%arg0: i32) -> (i32, i32) {
    %c0_i32 = arith.constant 0 : i32
    %c0_i32_0 = arith.constant 0 : i32
    %c0_i32_1 = arith.constant 0 : i32
    return %c0_i32, %c0_i32_0 : i32, i32
  }
  func.func @transform_2(%arg0: i32) -> (i32, i32) {
    %c0_i32 = arith.constant 0 : i32
    %c0_i32_0 = arith.constant 0 : i32
    %c0_i32_1 = arith.constant 0 : i32
    return %c0_i32, %c0_i32_0 : i32, i32
  }
  func.func @transform_3(%arg0: i32) -> (i32, i32) {
    %c0_i32 = arith.constant 0 : i32
    %c0_i32_0 = arith.constant 0 : i32
    %c0_i32_1 = arith.constant 0 : i32
    return %c0_i32, %c0_i32_0 : i32, i32
  }
  func.func @transform_4(%arg0: i32) -> (i32, i32) {
    %c0_i32 = arith.constant 0 : i32
    %c0_i32_0 = arith.constant 0 : i32
    %c0_i32_1 = arith.constant 0 : i32
    return %c0_i32, %c0_i32_0 : i32, i32
  }
  func.func @transform_5(%arg0: i32) -> (i32, i32) {
    %c0_i32 = arith.constant 0 : i32
    %c0_i32_0 = arith.constant 0 : i32
    %c0_i32_1 = arith.constant 0 : i32
    return %c0_i32, %c0_i32_0 : i32, i32
  }
  func.func @transform_6(%arg0: i32) -> (i32, i32) {
    %c0_i32 = arith.constant 0 : i32
    %c0_i32_0 = arith.constant 0 : i32
    %c0_i32_1 = arith.constant 0 : i32
    return %c0_i32, %c0_i32_0 : i32, i32
  }
  func.func @transform_7(%arg0: i32) -> (i32, i32) {
    %c0_i32 = arith.constant 0 : i32
    %c0_i32_0 = arith.constant 0 : i32
    return %c0_i32, %arg0 : i32, i32
  }
}

</mosaic_0001>

<bundles_post_ra>
// kernel: tpu_custom_call.1
= control target key start
LH: loop header
LB: loop body
LE: loop exit
PB: predicated region body
PF: predicated region fallthrough
CT: control target
= control target key end

     0   :  { %s608_s0 = inlined_call_operand.vmem [shape: f32[2,128], index: 0, kind: input, shape index: {}]   ;;  %s609_s1 = inlined_call_operand.vmem [shape: f32[10,2], index: 1, kind: input, shape index: {}]   ;;  %s610_s2 = inlined_call_operand.vmem [shape: f32[10,1], index: 2, kind: input, shape index: {}]   ;;  %s611_s3 = inlined_call_operand.vmem [shape: f32[10,10], index: 3, kind: input, shape index: {}]   ;;  %s612_s4 = inlined_call_operand.vmem [shape: f32[10,1], index: 4, kind: input, shape index: {}]   ;;  %s613_s5 = inlined_call_operand.vmem [shape: f32[1,10], index: 5, kind: input, shape index: {}]   ;;  %s614_s6 = inlined_call_operand.<no memory space> [shape: f32[1,1], index: 6, kind: input, shape index: {}]   ;;  %s615_s7 = inlined_call_operand.hbm [shape: f32[1,128], index: 7, kind: output, shape index: {}]  }
   0x1   :  { %v12_v0 = vstv %s614_s6 }
   0x2   :  { %13 = vst [vmem:[#allocation2] sm:$0x1] %v12_v0 }
   0x3   :  { %v35_v1 = vld [vmem:[%s610_s2] sm:$0xff]  ;;  %v476_v3 = vmov 1   ;;  %v477_v4 = vmov 0   ;;  %v36_v5 = vld [vmem:[%s610_s2 + $0x8] sm:$0x3] }
   0x4   :  { %v30_v2 = vld [vmem:[%s609_s1] sm:$0xff]  ;;  %421 = vset.pattern.permute.xlu0 %v476_v3  ;;  %420 = vset.pattern.permute.xlu1 %v477_v4 }
   0x5   :  { %55 = vperm.xlu1 %420, %v35_v1   ;;  %66 = vperm.xlu0 %421, %v30_v2   ;;  %v32_v6 = vld [vmem:[%s611_s3] sm:$0xff] }
   0x6   :  { %14 = vsyncpa [#allocation4], 0  ;;  %v31_v7 = vld [vmem:[%s609_s1 + $0x8] sm:$0x3]  ;;  %v478_v8 = vmov 3   ;;  %v479_v9 = vmov 6   ;;  %v47_v29 = vlaneseq }
   0x7   :  { %v83_v10 = vld [vmem:[%s612_s4] sm:$0xff]  ;;  %v480_v11 = vmov 9   ;;  %v84_v12 = vld [vmem:[%s612_s4 + $0x8] sm:$0x3]  ;;  %v481_v14 = vmov 2   ;;  %v482_v16 = vmov 4  }
   0x8   :  { %v33_v13 = vld [vmem:[%s611_s3 + $0x8] sm:$0x3]  ;;  %v34_v15 = vld [vmem:[%s613_s5] sm:$0x1]  ;;  %v483_v18 = vmov 5   ;;  %v484_v19 = vmov 7  }
   0x9   :  { %60 = vperm.xlu1 %420, %v36_v5   ;;  %114 = vperm.xlu0 %421, %v32_v6   ;;  %v259_v17 = vld [vmem:[#allocation2] sm:$0x1]  ;;  %v485_v20 = vmov 8   ;;  %v48_v31 = vshrl.u32 %v47_v29, 7 }
   0xa   :  { %v29_v35 = vld [vmem:[%s608_s0] sm:$0x3]  ;;  %s486_s0 = smov [#allocation3]  }
   0xb   :  { %v572_v34 = vsub.s32 0, %v48_v31  ;;  %v75_v39 = vsub.s32 1, %v48_v31  ;;  %v139_v54 = vsub.s32 2, %v48_v31  ;;  %v155_v59 = vsub.s32 3, %v48_v31  ;;  %s401_s5 = sshll.u32 %s486_s0, 4  ;;  %s402_s5 = int_to_ptr.vmem [resolvable:$true] %s401_s5 }
   0xc   :  { %s452_s18 = scalar_lea.vmem %s402_s5, 16  ;;  %s456_s19 = scalar_lea.vmem %s402_s5, 32 }
   0xd   :  { %422 = vset.pattern.permute.xlu1 %v476_v3  ;;  %426 = vset.pattern.permute.xlu0 %v478_v8  ;;  %v50_v37 = vrot.slane %v29_v35, %v572_v34  ;;  %v76_v42 = vrot.slane %v29_v35, %v75_v39  ;;  %p453_p0 = scmp.ne.s32.totalorder %s402_s5, %s452_s18  ;;  %p457_p1 = scmp.lt.s32.totalorder %s402_s5, %s402_s5 }
   0xe   :  { %70 = vperm.xlu1 %422, %v31_v7   ;;  %146 = vperm.xlu0 %426, %v32_v6   ;;  %p458_p2 = scmp.lt.s32.totalorder %s456_s19, %s452_s18 }
  0x10   :  { %p459_p3 = por %p458_p2, %p457_p1 }
  0x12   :  { %423 = vset.pattern.permute.xlu1 %v477_v4  ;;  %429 = vset.pattern.permute.xlu0 %v479_v9  ;;  %p460_p4 = pnand %p459_p3, %p453_p0 }
  0x13   :  { %87 = vperm.xlu1 %423, %v32_v6   ;;  %194 = vperm.xlu0 %429, %v32_v6  }
  0x17   :  { %103 = vperm.xlu1 %423, %v83_v10   ;;  %432 = vset.pattern.permute.xlu0 %v480_v11 }
  0x18   :  { %242 = vperm.xlu0 %432, %v32_v6  }
  0x1b   :  { %108 = vperm.xlu1 %423, %v84_v12   ;;  %v203_v12 = vsub.s32 6, %v48_v31 }
  0x1c   :  { %433 = vset.pattern.permute.xlu0 %v477_v4 }
  0x1d   :  { %39 = vperm.xlu0 %433, %v30_v2  }
  0x1f   :  { %424 = vset.pattern.permute.xlu1 %v476_v3 }
  0x20   :  { %118 = vperm.xlu1 %424, %v33_v13  }
  0x21   :  { %44 = vperm.xlu0 %433, %v31_v7  }
  0x24   :  { %425 = vset.pattern.permute.xlu1 %v481_v14 }
  0x25   :  { %130 = vperm.xlu1 %425, %v32_v6   ;;  %92 = vperm.xlu0 %433, %v33_v13  }
  0x29   :  { %427 = vset.pattern.permute.xlu1 %v482_v16  ;;  %262 = vperm.xlu0 %433, %v34_v15  }
  0x2a   :  { %162 = vperm.xlu1 %427, %v32_v6  }
  0x2d   :  { %272 = vperm.xlu0 %433, %v259_v17  }
  0x2e   :  { %428 = vset.pattern.permute.xlu1 %v483_v18 }
  0x2f   :  { %178 = vperm.xlu1 %428, %v32_v6  }
  0x31   :  { %439 = vset.pattern.permute.xlu0 %v483_v18 }
  0x32   :  { %182 = vperm.xlu0 %439, %v33_v13  }
  0x33   :  { %430 = vset.pattern.permute.xlu1 %v484_v19 }
  0x34   :  { %210 = vperm.xlu1 %430, %v32_v6  }
  0x36   :  { %442 = vset.pattern.permute.xlu0 %v482_v16 }
  0x37   :  { %320 = vperm.xlu0 %442, %v34_v15  }
  0x38   :  { %431 = vset.pattern.permute.xlu1 %v485_v20 }
  0x39   :  { %226 = vperm.xlu1 %431, %v32_v6  }
  0x3b   :  { %445 = vset.pattern.permute.xlu0 %v485_v20 }
  0x3c   :  { %230 = vperm.xlu0 %445, %v33_v13  }
  0x3d   :  { %434 = vset.pattern.permute.xlu1 %v481_v14 }
  0x3e   :  { %134 = vperm.xlu1 %434, %v33_v13  }
  0x40   :  { %448 = vset.pattern.permute.xlu0 %v484_v19 }
  0x41   :  { %359 = vperm.xlu0 %448, %v34_v15  }
  0x42   :  { %435 = vset.pattern.permute.xlu1 %v478_v8 }
  0x43   :  { %150 = vperm.xlu1 %435, %v33_v13  }
  0x45   :  { %451 = vset.pattern.permute.xlu0 %v480_v11 }
  0x47   :  { %436 = vset.pattern.permute.xlu1 %v476_v3  ;;  %v171_v3 = vsub.s32 4, %v48_v31 }
  0x48   :  { %281 = vperm.xlu1 %436, %v34_v15  }
  0x4c   :  { %437 = vset.pattern.permute.xlu1 %v482_v16 }
  0x4d   :  { %166 = vperm.xlu1 %437, %v33_v13  }
  0x51   :  { %438 = vset.pattern.permute.xlu1 %v481_v14 }
  0x52   :  { %294 = vperm.xlu1 %438, %v34_v15  }
  0x56   :  { %440 = vset.pattern.permute.xlu1 %v478_v8 }
  0x57   :  { %307 = vperm.xlu1 %440, %v34_v15  }
  0x5b   :  { %441 = vset.pattern.permute.xlu1 %v479_v9 }
  0x5c   :  { %198 = vperm.xlu1 %441, %v33_v13  }
  0x60   :  { %443 = vset.pattern.permute.xlu1 %v484_v19  ;;  %v219_v19 = vsub.s32 7, %v48_v31 }
  0x61   :  { %214 = vperm.xlu1 %443, %v33_v13  }
  0x65   :  { %444 = vset.pattern.permute.xlu1 %v483_v18 }
  0x66   :  { %333 = vperm.xlu1 %444, %v34_v15  }
  0x6a   :  { %446 = vset.pattern.permute.xlu1 %v479_v9  ;;  %v187_v9 = vsub.s32 5, %v48_v31 }
  0x6b   :  { %346 = vperm.xlu1 %446, %v34_v15  }
  0x6f   :  { %447 = vset.pattern.permute.xlu1 %v480_v11 }
  0x70   :  { %246 = vperm.xlu1 %447, %v33_v13  }
  0x74   :  { %449 = vset.pattern.permute.xlu1 %v485_v20 }
  0x75   :  { %372 = vperm.xlu1 %449, %v34_v15  }
  0x79   :  { %450 = vset.pattern.permute.xlu1 %v480_v11 }
  0x7a   :  { %382 = vperm.xlu1 %450, %v34_v15  }
  0x84   :  { %v56_v21 = vpop.permute.xlu1 %55  ;;  %v67_v22 = vpop.permute.xlu0 %66 }
  0x85   :  { %v77_v43 = vmul.f32 %v76_v42, %v67_v22 }
  0x88   :  { %v61_v23 = vpop.permute.xlu1 %60  ;;  %v115_v24 = vpop.permute.xlu0 %114 }
  0x8d   :  { %v71_v25 = vpop.permute.xlu1 %70  ;;  %v147_v26 = vpop.permute.xlu0 %146 }
  0x8e   :  { %v78_v10 = vmul.f32 %v76_v42, %v71_v25 }
  0x92   :  { %v88_v27 = vpop.permute.xlu1 %87  ;;  %v195_v28 = vpop.permute.xlu0 %194 }
  0x96   :  { %v104_v30 = vpop.permute.xlu1 %103 }
  0x97   :  { %v570_v33 = vpop.permute.xlu0 %242 }
  0x9a   :  { %v568_v32 = vpop.permute.xlu1 %108 }
  0x9c   :  { %v40_v38 = vpop.permute.xlu0 %39 }
  0x9d   :  { %v51_v40 = vmul.f32 %v50_v37, %v40_v38 }
  0x9f   :  { %v577_v36 = vpop.permute.xlu1 %118  ;;  %v63_v44 = vadd.f32 %v56_v21, %v51_v40 }
  0xa0   :  { %v45_v61 = vpop.permute.xlu0 %44 }
  0xa1   :  { %v79_v46 = vadd.f32 %v77_v43, %v63_v44  ;;  %v52_v1 = vmul.f32 %v50_v37, %v45_v61 }
  0xa3   :  { %v81_v48 = vmax.f32 %v79_v46, 0.0  ;;  %v64_v6 = vadd.f32 %v61_v23, %v52_v1 }
  0xa4   :  { %v131_v41 = vpop.permute.xlu1 %130  ;;  %v93_v17 = vpop.permute.xlu0 %92 }
  0xa5   :  { %v98_v50 = vrot.slane %v81_v48, %v572_v34  ;;  %v124_v53 = vrot.slane %v81_v48, %v75_v39  ;;  %v140_v58 = vrot.slane %v81_v48, %v139_v54  ;;  %v156_v63 = vrot.slane %v81_v48, %v155_v59 }
  0xa6   :  { %v172_v8 = vrot.slane %v81_v48, %v171_v3  ;;  %v80_v13 = vadd.f32 %v78_v10, %v64_v6  ;;  %v188_v15 = vrot.slane %v81_v48, %v187_v9  ;;  %v204_v20 = vrot.slane %v81_v48, %v203_v12 }
  0xa7   :  { %v99_v51 = vmul.f32 %v98_v50, %v88_v27  ;;  %v125_v57 = vmul.f32 %v124_v53, %v115_v24  ;;  %v141_v62 = vmul.f32 %v140_v58, %v131_v41  ;;  %v157_v4 = vmul.f32 %v156_v63, %v147_v26 }
  0xa8   :  { %v82_v21 = vmax.f32 %v80_v13, 0.0  ;;  %v205_v26 = vmul.f32 %v204_v20, %v195_v28  ;;  %v220_v27 = vrot.slane %v81_v48, %v219_v19  ;;  %v263_v23 = vpop.permute.xlu0 %262  ;;  %v100_v35 = vmul.f32 %v98_v50, %v93_v17 }
  0xa9   :  { %v163_v45 = vpop.permute.xlu1 %162  ;;  %v111_v55 = vadd.f32 %v104_v30, %v99_v51 }
  0xaa   :  { %v173_v11 = vmul.f32 %v172_v8, %v163_v45  ;;  %v236_v25 = vrot.slane %v82_v21, %v572_v34  ;;  %v252_v40 = vrot.slane %v82_v21, %v75_v39  ;;  %v112_v43 = vadd.f32 %v568_v32, %v100_v35 }
  0xab   :  { %v127_v60 = vadd.f32 %v125_v57, %v111_v55  ;;  %v126_v45 = vmul.f32 %v124_v53, %v577_v36  ;;  %v268_v55 = vrot.slane %v263_v23, %v572_v34 }
  0xac   :  { %v273_v42 = vpop.permute.xlu0 %272  ;;  %v253_v28 = vmul.f32 %v252_v40, %v570_v33 }
  0xad   :  { %v143_v2 = vadd.f32 %v141_v62, %v127_v60  ;;  %v128_v48 = vadd.f32 %v126_v45, %v112_v43 }
  0xae   :  { %v179_v47 = vpop.permute.xlu1 %178 }
  0xaf   :  { %v159_v7 = vadd.f32 %v157_v4, %v143_v2  ;;  %v189_v18 = vmul.f32 %v188_v15, %v179_v47 }
  0xb1   :  { %v175_v14 = vadd.f32 %v173_v11, %v159_v7  ;;  %v183_v51 = vpop.permute.xlu0 %182 }
  0xb2   :  { %v190_v61 = vmul.f32 %v188_v15, %v183_v51 }
  0xb3   :  { %v211_v49 = vpop.permute.xlu1 %210  ;;  %v191_v22 = vadd.f32 %v189_v18, %v175_v14 }
  0xb4   :  { %v221_v30 = vmul.f32 %v220_v27, %v211_v49 }
  0xb5   :  { %v207_v29 = vadd.f32 %v205_v26, %v191_v22 }
  0xb6   :  { %v321_v60 = vpop.permute.xlu0 %320 }
  0xb7   :  { %v223_v41 = vadd.f32 %v221_v30, %v207_v29 }
  0xb8   :  { %v227_v52 = vpop.permute.xlu1 %226 }
  0xb9   :  { %v237_v37 = vmul.f32 %v236_v25, %v227_v52 }
  0xbb   :  { %v239_v31 = vadd.f32 %v237_v37, %v223_v41  ;;  %v231_v6 = vpop.permute.xlu0 %230 }
  0xbd   :  { %v135_v56 = vpop.permute.xlu1 %134  ;;  %v255_v47 = vadd.f32 %v253_v28, %v239_v31 }
  0xbe   :  { %v142_v46 = vmul.f32 %v140_v58, %v135_v56  ;;  %v278_v56 = vrot.slane %v273_v42, %v572_v34 }
  0xbf   :  { %v257_v57 = vmax.f32 %v255_v47, 0.0 }
  0xc0   :  { %v144_v54 = vadd.f32 %v142_v46, %v128_v48 }
  0xc1   :  { %v269_v62 = vmul.f32 %v268_v55, %v257_v57 }
  0xc2   :  { %v151_v0 = vpop.permute.xlu1 %150 }
  0xc3   :  { %v158_v49 = vmul.f32 %v156_v63, %v151_v0  ;;  %v279_v7 = vadd.f32 %v278_v56, %v269_v62 }
  0xc5   :  { %v160_v32 = vadd.f32 %v158_v49, %v144_v54 }
  0xc7   :  { %v282_v5 = vpop.permute.xlu1 %281 }
  0xc8   :  { %v287_v50 = vrot.slane %v282_v5, %v572_v34  ;;  %v326_v5 = vrot.slane %v321_v60, %v572_v34 }
  0xca   :  { %v288_v36 = vmul.f32 %v287_v50, %v257_v57  ;;  %v327_v18 = vmul.f32 %v326_v5, %v257_v57 }
  0xcc   :  { %v167_v16 = vpop.permute.xlu1 %166  ;;  %v290_v1 = vrot.slane %v288_v36, 1  ;;  %v329_v29 = vrot.slane %v327_v18, 4 }
  0xcd   :  { %v174_v52 = vmul.f32 %v172_v8, %v167_v16  ;;  %v238_v16 = vmul.f32 %v236_v25, %v231_v6 }
  0xce   :  { %v292_v12 = vadd.f32 %v290_v1, %v279_v7 }
  0xcf   :  { %v176_v53 = vadd.f32 %v174_v52, %v160_v32 }
  0xd1   :  { %v295_v24 = vpop.permute.xlu1 %294  ;;  %v192_v3 = vadd.f32 %v190_v61, %v176_v53 }
  0xd2   :  { %v300_v59 = vrot.slane %v295_v24, %v572_v34 }
  0xd4   :  { %v301_v63 = vmul.f32 %v300_v59, %v257_v57 }
  0xd6   :  { %v308_v38 = vpop.permute.xlu1 %307  ;;  %v303_v8 = vrot.slane %v301_v63, 2 }
  0xd7   :  { %v313_v33 = vrot.slane %v308_v38, %v572_v34 }
  0xd8   :  { %v305_v17 = vadd.f32 %v303_v8, %v292_v12 }
  0xd9   :  { %v314_v2 = vmul.f32 %v313_v33, %v257_v57 }
  0xdb   :  { %v199_v44 = vpop.permute.xlu1 %198  ;;  %v316_v13 = vrot.slane %v314_v2, 3 }
  0xdc   :  { %v206_v0 = vmul.f32 %v204_v20, %v199_v44  ;;  %v360_v20 = vpop.permute.xlu0 %359 }
  0xdd   :  { %v318_v22 = vadd.f32 %v316_v13, %v305_v17  ;;  %v365_v23 = vrot.slane %v360_v20, %v572_v34 }
  0xde   :  { %v208_v9 = vadd.f32 %v206_v0, %v192_v3 }
  0xdf   :  { %v331_v37 = vadd.f32 %v329_v29, %v318_v22  ;;  %v366_v42 = vmul.f32 %v365_v23, %v257_v57 }
  0xe0   :  { %v215_v39 = vpop.permute.xlu1 %214 }
  0xe1   :  { %v222_v4 = vmul.f32 %v220_v27, %v215_v39  ;;  %v368_v28 = vrot.slane %v366_v42, 7 }
  0xe3   :  { %v224_v14 = vadd.f32 %v222_v4, %v208_v9 }
  0xe5   :  { %v334_v58 = vpop.permute.xlu1 %333  ;;  %v240_v26 = vadd.f32 %v238_v16, %v224_v14 }
  0xe6   :  { %v339_v10 = vrot.slane %v334_v58, %v572_v34 }
  0xe8   :  { %v340_v19 = vmul.f32 %v339_v10, %v257_v57 }
  0xea   :  { %v347_v11 = vpop.permute.xlu1 %346  ;;  %v342_v30 = vrot.slane %v340_v19, 5 }
  0xeb   :  { %v352_v15 = vrot.slane %v347_v11, %v572_v34 }
  0xec   :  { %v344_v43 = vadd.f32 %v342_v30, %v331_v37 }
  0xed   :  { %v353_v24 = vmul.f32 %v352_v15, %v257_v57 }
  0xef   :  { %v247_v21 = vpop.permute.xlu1 %246  ;;  %v355_v38 = vrot.slane %v353_v24, 6 }
  0xf0   :  { %v254_v27 = vmul.f32 %v252_v40, %v247_v21 }
  0xf1   :  { %v357_v44 = vadd.f32 %v355_v38, %v344_v43 }
  0xf2   :  { %v256_v35 = vadd.f32 %v254_v27, %v240_v26 }
  0xf3   :  { %v370_v48 = vadd.f32 %v368_v28, %v357_v44 }
  0xf4   :  { %v373_v41 = vpop.permute.xlu1 %372  ;;  %v258_v25 = vmax.f32 %v256_v35, 0.0 }
  0xf5   :  { %v378_v31 = vrot.slane %v373_v41, %v572_v34 }
  0xf7   :  { %v379_v46 = vmul.f32 %v378_v31, %v258_v25 }
  0xf9   :  { %v383_v45 = vpop.permute.xlu1 %382  ;;  %v380_v51 = vadd.f32 %v379_v46, %v370_v48 }
  0xfa   :  { %v388_v47 = vrot.slane %v383_v45, %v572_v34 }
  0xfc   :  { %v389_v40 = vmul.f32 %v388_v47, %v258_v25 }
  0xfe   :  { %v391_v49 = vrot.slane %v389_v40, 1 }
 0x100   :  { %v393_v54 = vadd.f32 %v391_v49, %v380_v51 }
 0x102   :  { %394 = vst [vmem:[#allocation3] sm:$0x1] %v393_v54 }
 0x103   :  { %463 = shalt.err (!%p460_p4)
}
 0x104   :  { %s464_s22 = scalar_lea.hbm %s615_s7, 16 }
 0x105   :  { %p465_p5 = scmp.ne.s32.totalorder %s615_s7, %s464_s22  ;;  %p468_p6 = scmp.lt.u32.totalorder %s464_s22, %s615_s7 }
 0x107   :  { %p470_p7 = pnand %p468_p6, %p465_p5 }
 0x109   :  { %473 = shalt.err (!%p470_p7)
}
 0x10a   :  { %404 = dma.vmem_to_hbm [thread:$0]  %s402_s5, 16, %s615_s7, [#allocation4]  }
 0x10b   :  { %474 = dma.done.wait [#allocation4], 16  }
 0x10c   :  { %475 = vsyncadd [#allocation4], 4294967280 }
 0x10d   :  { %408 = vsyncpa [#allocation4], 1 }

</bundles_post_ra>
